<compile_context>
chip_gen: v5e
topology: v5e:2x2
jax: 0.10.0
libtpu: 0.0.40
codegen_flags: <defaults>
</compile_context>

<pallas_src>
import functools

import jax
import jax.numpy as jnp
from jax import lax
from jax.experimental import pallas as pl
from jax.experimental.pallas import tpu as pltpu


def _moco_kernel(
    x1_ref, x2_ref,
    w1q_ref, b1q_ref, w2q_ref, b2q_ref,
    w1k_ref, b1k_ref, w2k_ref, b2k_ref,
    queue_ref,
    o_ref, acc_ref,
    *, n_valid, k_valid, tm, momentum, inv_temperature):
  i = pl.program_id(0)
  f32 = jnp.float32

  @pl.when(i == 0)
  def _():
    acc_ref[...] = jnp.zeros_like(acc_ref)

  x1 = x1_ref[...]
  x2 = x2_ref[...]

  # ---- query encoder: Linear -> ReLU -> Linear, then row L2-normalize ----
  hq = jnp.dot(x1, w1q_ref[...], preferred_element_type=f32) + b1q_ref[...]
  hq = jnp.maximum(hq, 0.0)
  q = jnp.dot(hq, w2q_ref[...], preferred_element_type=f32) + b2q_ref[...]
  q = q / jnp.maximum(jnp.sqrt(jnp.sum(q * q, axis=-1, keepdims=True)), 1e-12)

  # ---- momentum update of the key encoder (applied in-flight) ----
  m = f32(momentum)
  w1k = m * w1k_ref[...] + (1.0 - m) * w1q_ref[...]
  b1k = m * b1k_ref[...] + (1.0 - m) * b1q_ref[...]
  w2k = m * w2k_ref[...] + (1.0 - m) * w2q_ref[...]
  b2k = m * b2k_ref[...] + (1.0 - m) * b2q_ref[...]

  hk = jnp.maximum(jnp.dot(x2, w1k, preferred_element_type=f32) + b1k, 0.0)
  k = jnp.dot(hk, w2k, preferred_element_type=f32) + b2k
  k = k / jnp.maximum(jnp.sqrt(jnp.sum(k * k, axis=-1, keepdims=True)), 1e-12)

  # ---- contrastive logits (positive logit kept separate; no concat) ----
  l_pos = jnp.sum(q * k, axis=-1, keepdims=True) * inv_temperature          # (TM, 1)
  l_neg = jnp.dot(q, queue_ref[...],
                  preferred_element_type=f32) * inv_temperature             # (TM, Kp)

  # mask lane padding of the queue (large-negative, never inf -> no NaN)
  col = lax.broadcasted_iota(jnp.int32, l_neg.shape, 1)
  l_neg = jnp.where(col < k_valid, l_neg, -1e30)

  # cross-entropy against class 0: logsumexp(logits) - l_pos, per row
  row_max = jnp.maximum(l_pos, jnp.max(l_neg, axis=-1, keepdims=True))
  sum_exp = (jnp.exp(l_pos - row_max)
             + jnp.sum(jnp.exp(l_neg - row_max), axis=-1, keepdims=True))
  per_row = row_max + jnp.log(sum_exp) - l_pos                              # (TM, 1)

  # mask padded rows of the last tile
  row = lax.broadcasted_iota(jnp.int32, per_row.shape, 0) + i * tm
  per_row = jnp.where(row < n_valid, per_row, 0.0)

  acc_ref[...] += jnp.sum(per_row, axis=0, keepdims=True)

  @pl.when(i == pl.num_programs(0) - 1)
  def _():
    o_ref[...] = acc_ref[...] * (1.0 / n_valid)


def momentum_learning_loss(x1, x2, params, queue, *, temperature=0.07,
                           momentum=0.999, row_tile=8):
  n, h = x1.shape
  assert x2.shape == (n, h), "x1 and x2 must have the same (batch, hidden) shape"
  hq, k_size = queue.shape
  assert hq == h

  tm = row_tile
  n_pad = pl.cdiv(n, tm) * tm
  if n_pad != n:
    x1 = jnp.pad(x1, ((0, n_pad - n), (0, 0)))
    x2 = jnp.pad(x2, ((0, n_pad - n), (0, 0)))
  k_pad = pl.cdiv(k_size, 128) * 128
  if k_pad != k_size:
    queue = jnp.pad(queue, ((0, 0), (0, k_pad - k_size)))

  grid = (n_pad // tm,)
  row_spec = pl.BlockSpec((tm, h), lambda i: (i, 0))

  def resident(shape):
    # weights / queue: same block every grid step -> stay VMEM-resident
    return pl.BlockSpec(shape, lambda i: (0, 0))

  kernel = functools.partial(
      _moco_kernel,
      n_valid=n, k_valid=k_size, tm=tm,
      momentum=float(momentum), inv_temperature=float(1.0 / temperature))

  out = pl.pallas_call(
      kernel,
      out_shape=jax.ShapeDtypeStruct((1, 1), jnp.float32),
      grid_spec=pltpu.PrefetchScalarGridSpec(
          num_scalar_prefetch=0,
          grid=grid,
          in_specs=[
              row_spec, row_spec,
              resident((h, h)), resident((1, h)), resident((h, h)), resident((1, h)),
              resident((h, h)), resident((1, h)), resident((h, h)), resident((1, h)),
              resident((h, k_pad)),
          ],
          out_specs=pl.BlockSpec((1, 1), lambda i: (0, 0)),
          scratch_shapes=[pltpu.VMEM((1, 1), jnp.float32)]),
      compiler_params=pltpu.CompilerParams(
          dimension_semantics=("arbitrary",)),
  )(x1, x2,
    params["w1q"], params["b1q"], params["w2q"], params["b2q"],
    params["w1k"], params["b1k"], params["w2k"], params["b2k"],
    queue)
  return out[0, 0]


def ref_loss(x1, x2, p, queue, temperature=0.07, momentum=0.999):
  """Pure-JAX reference matching the PyTorch forward (labels=None path)."""
  def mlp(x, w1, b1, w2, b2):
    return jnp.maximum(x @ w1 + b1, 0.0) @ w2 + b2

  def l2norm(x):
    return x / jnp.maximum(jnp.linalg.norm(x, axis=1, keepdims=True), 1e-12)

  q = l2norm(mlp(x1, p["w1q"], p["b1q"], p["w2q"], p["b2q"]))
  m = momentum
  w1k = m * p["w1k"] + (1.0 - m) * p["w1q"]
  b1k = m * p["b1k"] + (1.0 - m) * p["b1q"]
  w2k = m * p["w2k"] + (1.0 - m) * p["w2q"]
  b2k = m * p["b2k"] + (1.0 - m) * p["b2q"]
  k = l2norm(mlp(x2, w1k, b1k, w2k, b2k))

  l_pos = jnp.sum(q * k, axis=1, keepdims=True)
  l_neg = q @ queue
  logits = jnp.concatenate([l_pos, l_neg], axis=1) / temperature
  lse = jax.scipy.special.logsumexp(logits, axis=1)
  return jnp.mean(lse - logits[:, 0])


if __name__ == "__main__":
  # Small shapes; N not a multiple of the row tile and QUEUE not a multiple of
  # 128 so the in-kernel masking paths are exercised.
  N, HIDDEN, QUEUE = 13, 32, 500

  key = jax.random.PRNGKey(0)
  ks = jax.random.split(key, 11)
  s = 0.1

  def w(k, shape):
    return jax.random.normal(k, shape, jnp.float32) * s

  x1 = jax.random.normal(ks[0], (N, HIDDEN), jnp.float32)
  x2 = jax.random.normal(ks[1], (N, HIDDEN), jnp.float32)
  params = dict(
      # weights stored as (in, out) so the kernel computes y = x @ W + b
      w1q=w(ks[2], (HIDDEN, HIDDEN)), b1q=w(ks[3], (1, HIDDEN)),
      w2q=w(ks[4], (HIDDEN, HIDDEN)), b2q=w(ks[5], (1, HIDDEN)),
      # the PyTorch module initializes encoder_k as a copy of encoder_q; here
      # they are distinct so the in-kernel momentum update is actually tested.
      w1k=w(ks[6], (HIDDEN, HIDDEN)), b1k=w(ks[7], (1, HIDDEN)),
      w2k=w(ks[8], (HIDDEN, HIDDEN)), b2k=w(ks[9], (1, HIDDEN)),
  )
  queue = jax.random.normal(ks[10], (HIDDEN, QUEUE), jnp.float32)
  queue = queue / jnp.maximum(
      jnp.linalg.norm(queue, axis=0, keepdims=True), 1e-12)

  loss = momentum_learning_loss(x1, x2, params, queue, row_tile=8)
  loss = jax.block_until_ready(loss)

  expected = ref_loss(x1, x2, params, queue)
  assert loss.shape == () and loss.dtype == jnp.float32
  err = float(jnp.abs(loss - expected))
  assert jnp.allclose(loss, expected, atol=1e-4, rtol=1e-4), err
  print("KERNEL_OK")
</pallas_src>

<mosaic_0001>
module attributes {stable_mosaic.version = 11 : i64} {
  func.func @_moco_kernel(%arg0: i32, %arg1: memref<8x32xf32, #tpu.memory_space<vmem>>, %arg2: memref<8x32xf32, #tpu.memory_space<vmem>>, %arg3: memref<32x32xf32, #tpu.memory_space<vmem>>, %arg4: memref<1x32xf32, #tpu.memory_space<vmem>>, %arg5: memref<32x32xf32, #tpu.memory_space<vmem>>, %arg6: memref<1x32xf32, #tpu.memory_space<vmem>>, %arg7: memref<32x32xf32, #tpu.memory_space<vmem>>, %arg8: memref<1x32xf32, #tpu.memory_space<vmem>>, %arg9: memref<32x32xf32, #tpu.memory_space<vmem>>, %arg10: memref<1x32xf32, #tpu.memory_space<vmem>>, %arg11: memref<32x512xf32, #tpu.memory_space<vmem>>, %arg12: memref<1x1xf32, #tpu.memory_space<vmem>>, %arg13: memref<1x1xf32, #tpu.memory_space<vmem>>) attributes {dimension_semantics = [#tpu.dimension_semantics<arbitrary>], iteration_bounds = array<i64: 2>, scalar_prefetch = 0 : i64, scratch_operands = 1 : i64, tpu.core_type = #tpu.core_type<tc>, window_params = [{transform_indices = @transform_0, window_bounds = array<i64: 8, 32>}, {transform_indices = @transform_1, window_bounds = array<i64: 8, 32>}, {pipeline_mode = #tpu.pipeline_mode<synchronous>, transform_indices = @transform_2, window_bounds = array<i64: 32, 32>}, {pipeline_mode = #tpu.pipeline_mode<synchronous>, transform_indices = @transform_3, window_bounds = array<i64: 1, 32>}, {pipeline_mode = #tpu.pipeline_mode<synchronous>, transform_indices = @transform_4, window_bounds = array<i64: 32, 32>}, {pipeline_mode = #tpu.pipeline_mode<synchronous>, transform_indices = @transform_5, window_bounds = array<i64: 1, 32>}, {pipeline_mode = #tpu.pipeline_mode<synchronous>, transform_indices = @transform_6, window_bounds = array<i64: 32, 32>}, {pipeline_mode = #tpu.pipeline_mode<synchronous>, transform_indices = @transform_7, window_bounds = array<i64: 1, 32>}, {pipeline_mode = #tpu.pipeline_mode<synchronous>, transform_indices = @transform_8, window_bounds = array<i64: 32, 32>}, {pipeline_mode = #tpu.pipeline_mode<synchronous>, transform_indices = @transform_9, window_bounds = array<i64: 1, 32>}, {pipeline_mode = #tpu.pipeline_mode<synchronous>, transform_indices = @transform_10, window_bounds = array<i64: 32, 512>}, {pipeline_mode = #tpu.pipeline_mode<synchronous>, transform_indices = @transform_11, window_bounds = array<i64: 1, 1>}]} {
    %c0_i32 = arith.constant 0 : i32
    %0 = arith.cmpi eq, %arg0, %c0_i32 : i32
    %1 = arith.extui %0 : i1 to i32
    %c0_i32_0 = arith.constant 0 : i32
    %2 = arith.cmpi ne, %1, %c0_i32_0 : i32
    scf.if %2 {
      %cst_65 = arith.constant 0.000000e+00 : f32
      %117 = vector.broadcast %cst_65 : f32 to vector<1x1xf32>
      %c0_66 = arith.constant 0 : index
      %c0_67 = arith.constant 0 : index
      %118 = vector.load %arg13[%c0_66, %c0_67] : memref<1x1xf32, #tpu.memory_space<vmem>>, vector<1x1xf32>
      tpu.vector_store %arg13[%c0_66, %c0_67], %117 {strides = array<i32>} : memref<1x1xf32, #tpu.memory_space<vmem>>, vector<1x1xf32>,
    } else {
    }
    %c0 = arith.constant 0 : index
    %c0_1 = arith.constant 0 : index
    %3 = vector.load %arg1[%c0, %c0_1] : memref<8x32xf32, #tpu.memory_space<vmem>>, vector<8x32xf32>
    %c0_2 = arith.constant 0 : index
    %c0_3 = arith.constant 0 : index
    %4 = vector.load %arg2[%c0_2, %c0_3] : memref<8x32xf32, #tpu.memory_space<vmem>>, vector<8x32xf32>
    %c0_4 = arith.constant 0 : index
    %c0_5 = arith.constant 0 : index
    %5 = vector.load %arg3[%c0_4, %c0_5] : memref<32x32xf32, #tpu.memory_space<vmem>>, vector<32x32xf32>
    %cst = arith.constant dense<0.000000e+00> : vector<8x32xf32>
    %6 = tpu.matmul %3, %5, %cst {dimension_numbers = #tpu.dot_dimension_numbers<[1], [0], [0], [1], [0, 0, 1, 1], [], []>} : vector<8x32xf32>, vector<32x32xf32>, vector<8x32xf32> -> vector<8x32xf32>
    %c0_6 = arith.constant 0 : index
    %c0_7 = arith.constant 0 : index
    %7 = vector.load %arg4[%c0_6, %c0_7] : memref<1x32xf32, #tpu.memory_space<vmem>>, vector<1x32xf32>
    %8 = vector.broadcast %7 : vector<1x32xf32> to vector<8x32xf32>
    %9 = arith.addf %6, %8 : vector<8x32xf32>
    %cst_8 = arith.constant 0.000000e+00 : f32
    %10 = vector.broadcast %cst_8 : f32 to vector<8x32xf32>
    %11 = arith.maximumf %9, %10 : vector<8x32xf32>
    %c0_9 = arith.constant 0 : index
    %c0_10 = arith.constant 0 : index
    %12 = vector.load %arg5[%c0_9, %c0_10] : memref<32x32xf32, #tpu.memory_space<vmem>>, vector<32x32xf32>
    %cst_11 = arith.constant dense<0.000000e+00> : vector<8x32xf32>
    %13 = tpu.matmul %11, %12, %cst_11 {dimension_numbers = #tpu.dot_dimension_numbers<[1], [0], [0], [1], [0, 0, 1, 1], [], []>} : vector<8x32xf32>, vector<32x32xf32>, vector<8x32xf32> -> vector<8x32xf32>
    %c0_12 = arith.constant 0 : index
    %c0_13 = arith.constant 0 : index
    %14 = vector.load %arg6[%c0_12, %c0_13] : memref<1x32xf32, #tpu.memory_space<vmem>>, vector<1x32xf32>
    %15 = vector.broadcast %14 : vector<1x32xf32> to vector<8x32xf32>
    %16 = arith.addf %13, %15 : vector<8x32xf32>
    %17 = arith.mulf %16, %16 : vector<8x32xf32>
    %cst_14 = arith.constant dense<0.000000e+00> : vector<8xf32>
    %18 = vector.multi_reduction <add>, %17, %cst_14 [1] : vector<8x32xf32> to vector<8xf32>
    %19 = vector.shape_cast %18 : vector<8xf32> to vector<8x1xf32>
    %20 = math.sqrt %19 : vector<8x1xf32>
    %cst_15 = arith.constant 9.99999996E-13 : f32
    %21 = vector.broadcast %cst_15 : f32 to vector<8x1xf32>
    %22 = arith.maximumf %20, %21 : vector<8x1xf32>
    %23 = vector.broadcast %22 : vector<8x1xf32> to vector<8x32xf32>
    %24 = arith.divf %16, %23 : vector<8x32xf32>
    %c0_16 = arith.constant 0 : index
    %c0_17 = arith.constant 0 : index
    %25 = vector.load %arg7[%c0_16, %c0_17] : memref<32x32xf32, #tpu.memory_space<vmem>>, vector<32x32xf32>
    %cst_18 = arith.constant 9.990000e-01 : f32
    %26 = vector.broadcast %cst_18 : f32 to vector<32x32xf32>
    %27 = arith.mulf %26, %25 : vector<32x32xf32>
    %cst_19 = arith.constant 1.000000e+00 : f32
    %cst_20 = arith.constant 9.990000e-01 : f32
    %28 = arith.subf %cst_19, %cst_20 : f32
    %c0_21 = arith.constant 0 : index
    %c0_22 = arith.constant 0 : index
    %29 = vector.load %arg3[%c0_21, %c0_22] : memref<32x32xf32, #tpu.memory_space<vmem>>, vector<32x32xf32>
    %30 = vector.broadcast %28 : f32 to vector<32x32xf32>
    %31 = arith.mulf %30, %29 : vector<32x32xf32>
    %32 = arith.addf %27, %31 : vector<32x32xf32>
    %c0_23 = arith.constant 0 : index
    %c0_24 = arith.constant 0 : index
    %33 = vector.load %arg8[%c0_23, %c0_24] : memref<1x32xf32, #tpu.memory_space<vmem>>, vector<1x32xf32>
    %cst_25 = arith.constant 9.990000e-01 : f32
    %34 = vector.broadcast %cst_25 : f32 to vector<1x32xf32>
    %35 = arith.mulf %34, %33 : vector<1x32xf32>
    %cst_26 = arith.constant 1.000000e+00 : f32
    %cst_27 = arith.constant 9.990000e-01 : f32
    %36 = arith.subf %cst_26, %cst_27 : f32
    %c0_28 = arith.constant 0 : index
    %c0_29 = arith.constant 0 : index
    %37 = vector.load %arg4[%c0_28, %c0_29] : memref<1x32xf32, #tpu.memory_space<vmem>>, vector<1x32xf32>
    %38 = vector.broadcast %36 : f32 to vector<1x32xf32>
    %39 = arith.mulf %38, %37 : vector<1x32xf32>
    %40 = arith.addf %35, %39 : vector<1x32xf32>
    %c0_30 = arith.constant 0 : index
    %c0_31 = arith.constant 0 : index
    %41 = vector.load %arg9[%c0_30, %c0_31] : memref<32x32xf32, #tpu.memory_space<vmem>>, vector<32x32xf32>
    %cst_32 = arith.constant 9.990000e-01 : f32
    %42 = vector.broadcast %cst_32 : f32 to vector<32x32xf32>
    %43 = arith.mulf %42, %41 : vector<32x32xf32>
    %cst_33 = arith.constant 1.000000e+00 : f32
    %cst_34 = arith.constant 9.990000e-01 : f32
    %44 = arith.subf %cst_33, %cst_34 : f32
    %c0_35 = arith.constant 0 : index
    %c0_36 = arith.constant 0 : index
    %45 = vector.load %arg5[%c0_35, %c0_36] : memref<32x32xf32, #tpu.memory_space<vmem>>, vector<32x32xf32>
    %46 = vector.broadcast %44 : f32 to vector<32x32xf32>
    %47 = arith.mulf %46, %45 : vector<32x32xf32>
    %48 = arith.addf %43, %47 : vector<32x32xf32>
    %c0_37 = arith.constant 0 : index
    %c0_38 = arith.constant 0 : index
    %49 = vector.load %arg10[%c0_37, %c0_38] : memref<1x32xf32, #tpu.memory_space<vmem>>, vector<1x32xf32>
    %cst_39 = arith.constant 9.990000e-01 : f32
    %50 = vector.broadcast %cst_39 : f32 to vector<1x32xf32>
    %51 = arith.mulf %50, %49 : vector<1x32xf32>
    %cst_40 = arith.constant 1.000000e+00 : f32
    %cst_41 = arith.constant 9.990000e-01 : f32
    %52 = arith.subf %cst_40, %cst_41 : f32
    %c0_42 = arith.constant 0 : index
    %c0_43 = arith.constant 0 : index
    %53 = vector.load %arg6[%c0_42, %c0_43] : memref<1x32xf32, #tpu.memory_space<vmem>>, vector<1x32xf32>
    %54 = vector.broadcast %52 : f32 to vector<1x32xf32>
    %55 = arith.mulf %54, %53 : vector<1x32xf32>
    %56 = arith.addf %51, %55 : vector<1x32xf32>
    %cst_44 = arith.constant dense<0.000000e+00> : vector<8x32xf32>
    %57 = tpu.matmul %4, %32, %cst_44 {dimension_numbers = #tpu.dot_dimension_numbers<[1], [0], [0], [1], [0, 0, 1, 1], [], []>} : vector<8x32xf32>, vector<32x32xf32>, vector<8x32xf32> -> vector<8x32xf32>
    %58 = vector.broadcast %40 : vector<1x32xf32> to vector<8x32xf32>
    %59 = arith.addf %57, %58 : vector<8x32xf32>
    %cst_45 = arith.constant 0.000000e+00 : f32
    %60 = vector.broadcast %cst_45 : f32 to vector<8x32xf32>
    %61 = arith.maximumf %59, %60 : vector<8x32xf32>
    %cst_46 = arith.constant dense<0.000000e+00> : vector<8x32xf32>
    %62 = tpu.matmul %61, %48, %cst_46 {dimension_numbers = #tpu.dot_dimension_numbers<[1], [0], [0], [1], [0, 0, 1, 1], [], []>} : vector<8x32xf32>, vector<32x32xf32>, vector<8x32xf32> -> vector<8x32xf32>
    %63 = vector.broadcast %56 : vector<1x32xf32> to vector<8x32xf32>
    %64 = arith.addf %62, %63 : vector<8x32xf32>
    %65 = arith.mulf %64, %64 : vector<8x32xf32>
    %cst_47 = arith.constant dense<0.000000e+00> : vector<8xf32>
    %66 = vector.multi_reduction <add>, %65, %cst_47 [1] : vector<8x32xf32> to vector<8xf32>
    %67 = vector.shape_cast %66 : vector<8xf32> to vector<8x1xf32>
    %68 = math.sqrt %67 : vector<8x1xf32>
    %cst_48 = arith.constant 9.99999996E-13 : f32
    %69 = vector.broadcast %cst_48 : f32 to vector<8x1xf32>
    %70 = arith.maximumf %68, %69 : vector<8x1xf32>
    %71 = vector.broadcast %70 : vector<8x1xf32> to vector<8x32xf32>
    %72 = arith.divf %64, %71 : vector<8x32xf32>
    %73 = arith.mulf %24, %72 : vector<8x32xf32>
    %cst_49 = arith.constant dense<0.000000e+00> : vector<8xf32>
    %74 = vector.multi_reduction <add>, %73, %cst_49 [1] : vector<8x32xf32> to vector<8xf32>
    %75 = vector.shape_cast %74 : vector<8xf32> to vector<8x1xf32>
    %cst_50 = arith.constant 14.2857141 : f32
    %76 = vector.broadcast %cst_50 : f32 to vector<8x1xf32>
    %77 = arith.mulf %75, %76 : vector<8x1xf32>
    %c0_51 = arith.constant 0 : index
    %c0_52 = arith.constant 0 : index
    %78 = vector.load %arg11[%c0_51, %c0_52] : memref<32x512xf32, #tpu.memory_space<vmem>>, vector<32x512xf32>
    %cst_53 = arith.constant dense<0.000000e+00> : vector<8x512xf32>
    %79 = tpu.matmul %24, %78, %cst_53 {dimension_numbers = #tpu.dot_dimension_numbers<[1], [0], [0], [1], [0, 0, 1, 1], [], []>} : vector<8x32xf32>, vector<32x512xf32>, vector<8x512xf32> -> vector<8x512xf32>
    %cst_54 = arith.constant 14.2857141 : f32
    %80 = vector.broadcast %cst_54 : f32 to vector<8x512xf32>
    %81 = arith.mulf %79, %80 : vector<8x512xf32>
    %82 = tpu.iota {dimensions = array<i32: 1>} : vector<8x512xi32>
    %c500_i32 = arith.constant 500 : i32
    %83 = vector.broadcast %c500_i32 : i32 to vector<8x512xi32>
    %84 = arith.cmpi slt, %82, %83 : vector<8x512xi32>
    %cst_55 = arith.constant -1.000000e+30 : f32
    %85 = vector.broadcast %cst_55 : f32 to vector<8x512xf32>
    %86 = arith.select %84, %81, %85 : vector<8x512xi1>, vector<8x512xf32>
    %cst_56 = arith.constant dense<0xFF800000> : vector<8xf32>
    %87 = vector.multi_reduction <maximumf>, %86, %cst_56 [1] : vector<8x512xf32> to vector<8xf32>
    %88 = vector.shape_cast %87 : vector<8xf32> to vector<8x1xf32>
    %89 = arith.maximumf %77, %88 : vector<8x1xf32>
    %90 = arith.subf %77, %89 : vector<8x1xf32>
    %91 = math.exp %90 : vector<8x1xf32>
    %92 = vector.broadcast %89 : vector<8x1xf32> to vector<8x512xf32>
    %93 = arith.subf %86, %92 : vector<8x512xf32>
    %94 = math.exp %93 : vector<8x512xf32>
    %cst_57 = arith.constant dense<0.000000e+00> : vector<8xf32>
    %95 = vector.multi_reduction <add>, %94, %cst_57 [1] : vector<8x512xf32> to vector<8xf32>
    %96 = vector.shape_cast %95 : vector<8xf32> to vector<8x1xf32>
    %97 = arith.addf %91, %96 : vector<8x1xf32>
    %98 = math.log %97 : vector<8x1xf32>
    %99 = arith.addf %89, %98 : vector<8x1xf32>
    %100 = arith.subf %99, %77 : vector<8x1xf32>
    %101 = tpu.iota {dimensions = array<i32: 0>} : vector<8x1xi32>
    %c8_i32 = arith.constant 8 : i32
    %102 = arith.muli %arg0, %c8_i32 : i32
    %103 = vector.broadcast %102 : i32 to vector<8x1xi32>
    %104 = arith.addi %101, %103 : vector<8x1xi32>
    %c13_i32 = arith.constant 13 : i32
    %105 = vector.broadcast %c13_i32 : i32 to vector<8x1xi32>
    %106 = arith.cmpi slt, %104, %105 : vector<8x1xi32>
    %cst_58 = arith.constant 0.000000e+00 : f32
    %107 = vector.broadcast %cst_58 : f32 to vector<8x1xf32>
    %108 = arith.select %106, %100, %107 : vector<8x1xi1>, vector<8x1xf32>
    %c0_59 = arith.constant 0 : index
    %c0_60 = arith.constant 0 : index
    %109 = vector.load %arg13[%c0_59, %c0_60] : memref<1x1xf32, #tpu.memory_space<vmem>>, vector<1x1xf32>
    %cst_61 = arith.constant dense<0.000000e+00> : vector<1xf32>
    %110 = vector.multi_reduction <add>, %108, %cst_61 [0] : vector<8x1xf32> to vector<1xf32>
    %111 = vector.shape_cast %110 : vector<1xf32> to vector<1x1xf32>
    %112 = arith.addf %109, %111 : vector<1x1xf32>
    %c0_62 = arith.constant 0 : index
    %c0_63 = arith.constant 0 : index
    %113 = vector.load %arg13[%c0_62, %c0_63] : memref<1x1xf32, #tpu.memory_space<vmem>>, vector<1x1xf32>
    tpu.vector_store %arg13[%c0_62, %c0_63], %112 {strides = array<i32>} : memref<1x1xf32, #tpu.memory_space<vmem>>, vector<1x1xf32>,
    %c1_i32 = arith.constant 1 : i32
    %114 = arith.cmpi eq, %arg0, %c1_i32 : i32
    %115 = arith.extui %114 : i1 to i32
    %c0_i32_64 = arith.constant 0 : i32
    %116 = arith.cmpi ne, %115, %c0_i32_64 : i32
    scf.if %116 {
      %c0_65 = arith.constant 0 : index
      %c0_66 = arith.constant 0 : index
      %117 = vector.load %arg13[%c0_65, %c0_66] : memref<1x1xf32, #tpu.memory_space<vmem>>, vector<1x1xf32>
      %cst_67 = arith.constant 0.0769230798 : f32
      %118 = vector.broadcast %cst_67 : f32 to vector<1x1xf32>
      %119 = arith.mulf %117, %118 : vector<1x1xf32>
      %c0_68 = arith.constant 0 : index
      %c0_69 = arith.constant 0 : index
      %120 = vector.load %arg12[%c0_68, %c0_69] : memref<1x1xf32, #tpu.memory_space<vmem>>, vector<1x1xf32>
      tpu.vector_store %arg12[%c0_68, %c0_69], %119 {strides = array<i32>} : memref<1x1xf32, #tpu.memory_space<vmem>>, vector<1x1xf32>,
    } else {
    }
    return
  }
  func.func @transform_0(%arg0: i32) -> (i32, i32) {
    %c0_i32 = arith.constant 0 : i32
    %c0_i32_0 = arith.constant 0 : i32
    return %arg0, %c0_i32 : i32, i32
  }
  func.func @transform_1(%arg0: i32) -> (i32, i32) {
    %c0_i32 = arith.constant 0 : i32
    %c0_i32_0 = arith.constant 0 : i32
    return %arg0, %c0_i32 : i32, i32
  }
  func.func @transform_2(%arg0: i32) -> (i32, i32) {
    %c0_i32 = arith.constant 0 : i32
    %c0_i32_0 = arith.constant 0 : i32
    %c0_i32_1 = arith.constant 0 : i32
    return %c0_i32, %c0_i32_0 : i32, i32
  }
  func.func @transform_3(%arg0: i32) -> (i32, i32) {
    %c0_i32 = arith.constant 0 : i32
    %c0_i32_0 = arith.constant 0 : i32
    %c0_i32_1 = arith.constant 0 : i32
    return %c0_i32, %c0_i32_0 : i32, i32
  }
  func.func @transform_4(%arg0: i32) -> (i32, i32) {
    %c0_i32 = arith.constant 0 : i32
    %c0_i32_0 = arith.constant 0 : i32
    %c0_i32_1 = arith.constant 0 : i32
    return %c0_i32, %c0_i32_0 : i32, i32
  }
  func.func @transform_5(%arg0: i32) -> (i32, i32) {
    %c0_i32 = arith.constant 0 : i32
    %c0_i32_0 = arith.constant 0 : i32
    %c0_i32_1 = arith.constant 0 : i32
    return %c0_i32, %c0_i32_0 : i32, i32
  }
  func.func @transform_6(%arg0: i32) -> (i32, i32) {
    %c0_i32 = arith.constant 0 : i32
    %c0_i32_0 = arith.constant 0 : i32
    %c0_i32_1 = arith.constant 0 : i32
    return %c0_i32, %c0_i32_0 : i32, i32
  }
  func.func @transform_7(%arg0: i32) -> (i32, i32) {
    %c0_i32 = arith.constant 0 : i32
    %c0_i32_0 = arith.constant 0 : i32
    %c0_i32_1 = arith.constant 0 : i32
    return %c0_i32, %c0_i32_0 : i32, i32
  }
  func.func @transform_8(%arg0: i32) -> (i32, i32) {
    %c0_i32 = arith.constant 0 : i32
    %c0_i32_0 = arith.constant 0 : i32
    %c0_i32_1 = arith.constant 0 : i32
    return %c0_i32, %c0_i32_0 : i32, i32
  }
  func.func @transform_9(%arg0: i32) -> (i32, i32) {
    %c0_i32 = arith.constant 0 : i32
    %c0_i32_0 = arith.constant 0 : i32
    %c0_i32_1 = arith.constant 0 : i32
    return %c0_i32, %c0_i32_0 : i32, i32
  }
  func.func @transform_10(%arg0: i32) -> (i32, i32) {
    %c0_i32 = arith.constant 0 : i32
    %c0_i32_0 = arith.constant 0 : i32
    %c0_i32_1 = arith.constant 0 : i32
    return %c0_i32, %c0_i32_0 : i32, i32
  }
  func.func @transform_11(%arg0: i32) -> (i32, i32) {
    %c0_i32 = arith.constant 0 : i32
    %c0_i32_0 = arith.constant 0 : i32
    %c0_i32_1 = arith.constant 0 : i32
    return %c0_i32, %c0_i32_0 : i32, i32
  }
}

</mosaic_0001>

<bundles_post_ra>
// kernel: tpu_custom_call.1
= control target key start
LH: loop header
LB: loop body
LE: loop exit
PB: predicated region body
PF: predicated region fallthrough
CT: control target
= control target key end

     0   :  { %s1794_s0 = inlined_call_operand.hbm [shape: f32[16,32], index: 0, kind: input, shape index: {}]   ;;  %s1795_s1 = inlined_call_operand.hbm [shape: f32[16,32], index: 1, kind: input, shape index: {}]   ;;  %s1796_s2 = inlined_call_operand.hbm [shape: f32[32,32], index: 2, kind: input, shape index: {}]   ;;  %s1797_s3 = inlined_call_operand.vmem [shape: f32[1,32], index: 3, kind: input, shape index: {}]   ;;  %s1798_s4 = inlined_call_operand.hbm [shape: f32[32,32], index: 4, kind: input, shape index: {}]   ;;  %s1799_s5 = inlined_call_operand.vmem [shape: f32[1,32], index: 5, kind: input, shape index: {}]   ;;  %s1800_s6 = inlined_call_operand.hbm [shape: f32[32,32], index: 6, kind: input, shape index: {}]   ;;  %s1801_s7 = inlined_call_operand.vmem [shape: f32[1,32], index: 7, kind: input, shape index: {}]   ;;  %s1802_s8 = inlined_call_operand.hbm [shape: f32[32,32], index: 8, kind: input, shape index: {}]   ;;  %s1803_s9 = inlined_call_operand.vmem [shape: f32[1,32], index: 9, kind: input, shape index: {}]   ;;  %s1804_s10 = inlined_call_operand.hbm [shape: f32[32,512], index: 10, kind: input, shape index: {}]   ;;  %s1805_s11 = inlined_call_operand.hbm [shape: f32[1,1], index: 11, kind: output, shape index: {}]  }
   0x1   :  { %1806 = sst [smem:[#allocation22_spill]] %s1796_s2 }
   0x2   :  { %1807 = sst [smem:[#allocation23_spill]] %s1798_s4 }
   0x3   :  { %1808 = sst [smem:[#allocation24_spill]] %s1800_s6 }
   0x4   :  { %1809 = sst [smem:[#allocation25_spill]] %s1802_s8 }
   0x5   :  { %1810 = sst [smem:[#allocation26_spill]] %s1804_s10 }
   0x6   :  { %1811 = sst [smem:[#allocation27_spill]] %s1805_s11 }
   0x7   :  { %16 = vsyncpa [#allocation4], 0 }
   0x8   :  { %18 = vsyncpa [#allocation4 + $0x1], 0 }
   0x9   :  { %19 = vsyncpa [#allocation7], 0 }
   0xa   :  { %21 = vsyncpa [#allocation7 + $0x1], 0 }
   0xb   :  { %22 = vsyncpa [#allocation10], 0 }
   0xc   :  { %23 = vsyncpa [#allocation13], 0 }
   0xd   :  { %24 = vsyncpa [#allocation5], 0  ;;  %s1576_s17 = smov 0   ;;  %s1578_s18 = smov 0  }
   0xe   :  { %s1580_s19 = smov 0   ;;  %s1582_s20 = smov 0  }
   0xf LB: > { %s1812_s2 = sld [smem:[#allocation22_spill]]  ;;  %s1600_s24 = sadd.s32 4294967295, %s1503_s20   ;;  %s1503_s20 = sphi %s1582_s20, %s1825_s20   ;;  %s1499_s19 = sphi %s1580_s19, %s1824_s19   ;;  %s1495_s18 = sphi %s1578_s18, %s1823_s18   ;;  %s1491_s17 = sphi %s1576_s17, %s1822_s17  }
  0x10   : > { %p1048_p0 = scmp.ge.s32.totalorder %s1503_s20, 1  ;;  %p51_p1 = scmp.eq.s32.totalorder %s1600_s24, 0 }
  0x11   : > { %p297_p2 = scmp.lt.s32.totalorder %s1503_s20, 3  ;;  %p1049_p3 = scmp.ne.s32.totalorder %s1600_s24, 0 }
  0x12   : > { %s1505_s26 = smov [#allocation8]   ;;  %s1814_s4 = sld [smem:[#allocation23_spill]] }
  0x13   : > { %p1606_p4 = pnand %p1048_p0, %p297_p2  ;;  %s310_s27 = sshll.u32 %s1505_s26, 4  ;;  %s311_s27 = int_to_ptr.vmem [resolvable:$true] %s310_s27 }
  0x14   : > { %s1816_s8 = sld [smem:[#allocation25_spill]]  ;;  %s1506_s16 = smov [#allocation9]  }
  0x15   : > { %s308_s23 = sshll.u32 %s1812_s2, 4  ;;  %p1110_p5 = pneg %p1606_p4  ;;  %s309_s23 = int_to_ptr.hbm [resolvable:$true] %s308_s23 }
  0x16   : > { %s327_s21 = sshll.u32 %s1506_s16, 4  ;;  %s1507_s22 = smov 128   ;;  %s328_s21 = int_to_ptr.vmem [resolvable:$true] %s327_s21 }
  0x17   : > { %p1617_p6 = pnand %p1110_p5, %p51_p1  ;;  %s1508_s26 = smov 8  }
  0x18   : > { %s325_s30 = sshll.u32 %s1814_s4, 4  ;;  %s1817_s6 = sld [smem:[#allocation24_spill]]  ;;  %s326_s30 = int_to_ptr.hbm [resolvable:$true] %s325_s30 }
  0x19   : > { %1113 = dma.hbm_to_vmem [thread:$0]  (!%p1617_p6), %s309_s23, 512, %s311_s27, [#allocation7], %s1507_s22, %s1507_s22, %s1508_s26  }
  0x1a   : > { %s359_s15 = sshll.u32 %s1816_s8, 4  ;;  %s1509_s4 = smov [#allocation12]   ;;  %s360_s15 = int_to_ptr.hbm [resolvable:$true] %s359_s15 }
  0x1b   : > { %1116 = dma.hbm_to_vmem [thread:$0]  (!%p1617_p6), %s326_s30, 512, %s328_s21, [#allocation10], %s1507_s22, %s1507_s22, %s1508_s26  }
  0x1c   : > { %s361_s11 = sshll.u32 %s1509_s4, 4  ;;  %s1510_s13 = smov [#allocation11]   ;;  %s362_s11 = int_to_ptr.vmem [resolvable:$true] %s361_s11 }
  0x1d   : > { %1122 = dma.hbm_to_vmem [thread:$0]  (!%p1617_p6), %s360_s15, 512, %s362_s11, [#allocation13], %s1507_s22, %s1507_s22, %s1508_s26  }
  0x1e   : > { %s342_s2 = sshll.u32 %s1817_s6, 4  ;;  %s344_s23 = sshll.u32 %s1510_s13, 4  ;;  %s343_s2 = int_to_ptr.hbm [resolvable:$true] %s342_s2  ;;  %s345_s23 = int_to_ptr.vmem [resolvable:$true] %s344_s23 }
  0x1f   : > { %s1818_s10 = sld [smem:[#allocation26_spill]]  ;;  %s1511_s4 = smov [#allocation14]  }
  0x20   : > { %1119 = dma.hbm_to_vmem [thread:$0]  (!%p1617_p6), %s343_s2, 512, %s345_s23, [#allocation10], %s1507_s22, %s1507_s22, %s1508_s26  }
  0x21   : > { %s378_s11 = sshll.u32 %s1511_s4, 4  ;;  %s1512_s15 = smov 512   ;;  %s379_s11 = int_to_ptr.vmem [resolvable:$true] %s378_s11 }
  0x22   : > { %s1513_s16 = smov 32   ;;  %s1641_s21 = sadd.s32 1, %s1503_s20  }
  0x23   : > { %s34_s28 = ssub.s32 %s1503_s20, %s1641_s21  ;;  %s37_s29 = sadd.s32 1, %s1499_s19 }
  0x24   : > { %p35_p7 = scmp.eq.s32.totalorder %s34_s28, 0  ;;  %p44_p8 = scmp.ne.s32.totalorder %s1499_s19, %s1495_s18 }
  0x25   : > { %s376_s14 = sshll.u32 %s1818_s10, 4  ;;  %p45_p9 = scmp.eq.s32.totalorder %s1503_s20, 0  ;;  %s377_s14 = int_to_ptr.hbm [resolvable:$true] %s376_s14 }
  0x26   : > { %1125 = dma.hbm_to_vmem [thread:$0]  (!%p1617_p6), %s377_s14, 2048, %s379_s11, [#allocation13], %s1512_s15, %s1512_s15, %s1513_s16  }
  0x27   : > { %p50_p10 = scmp.ne.s32.totalorder %s1495_s18, %s1491_s17  ;;  %p46_p11 = por %p45_p9, %p44_p8 }
  0x28   : > { %s1652_s2 = scalar_select %p35_p7, %s1499_s19, %s37_s29  }
  0x29   : > { %p1656_p12 = por %p51_p1, %p50_p10  ;;  %p1138_p13 = scmp.lt.s32.totalorder %s1503_s20, 2 }
  0x2a   : > { %s392_s12 = sand.u32 1, %s1499_s19   ;;  %s1056_s13 = sshll.u32 %s1503_s20, 3 }
  0x2b   : > { %s1662_s26 = sshll.u32 %s392_s12, 3  ;;  %s400_s30 = scalar_lea.hbm %s1794_s0, %s1056_s13 }
  0x2c   : > { %s396_s17 = scalar_lea.vmem [#allocation3], %s1662_s26  ;;  %s402_s4 = sshll.u32 %s400_s30, 4  ;;  %s403_s4 = int_to_ptr.hbm [resolvable:$true] %s402_s4 }
  0x2d   : > { %s404_s14 = sshll.u32 %s396_s17, 4  ;;  %p1669_p0 = pnand %p1138_p13, %p46_p11  ;;  %s405_s14 = int_to_ptr.vmem [resolvable:$true] %s404_s14 }
  0x2e   : > { %s419_s28 = scalar_lea.hbm %s1795_s1, %s1056_s13  ;;  %s411_s29 = sand.u32 1, %s1503_s20  }
  0x2f   : > { %s393_s6 = scalar_lea.sflag [#allocation4], %s392_s12  ;;  %s1361_s8 = sshra.s32 %s403_s4, 4  ;;  %s1362_s8 = int_to_ptr.hbm [resolvable:$true] %s1361_s8 }
  0x30   : > { %s1363_s23 = scalar_lea.hbm %s1362_s8, 8  ;;  %p1365_p5 = pneg %p1669_p0 }
  0x31   : > { %p1364_p2 = scmp.ne.s32.totalorder %s1362_s8, %s1363_s23  ;;  %s1368_s17 = scalar_lea.hbm %s1794_s0, 16 }
  0x32   : > { %p1369_p8 = scmp.lt.s32.totalorder %s1362_s8, %s1794_s0  ;;  %p1370_p9 = scmp.lt.s32.totalorder %s1368_s17, %s1363_s23 }
  0x33   : > { %p1366_p6 = pnand %p1365_p5, %p1364_p2 }
  0x34   : > { %p1371_p10 = por %p1370_p9, %p1369_p8 }
  0x35   : > { %p1367_p7 = pneg %p1366_p6 }
  0x37   : > { %p1372_p11 = pnand %p1371_p10, %p1367_p7 }
  0x39   : > { %1375 = shalt.err (!%p1372_p11)
}
  0x3a   : > { %1129 = dma.hbm_to_vmem [thread:$0]  (!%p1669_p0), %s403_s4, 128, %s405_s14, %s393_s6  }
  0x3b   : > { %s421_s20 = sshll.u32 %s419_s28, 4  ;;  %s415_s12 = scalar_lea.vmem [#allocation6], %s1662_s26  ;;  %s422_s20 = int_to_ptr.hbm [resolvable:$true] %s421_s20 }
  0x3c   : > { %s423_s13 = sshll.u32 %s415_s12, 4  ;;  %s412_s27 = scalar_lea.sflag [#allocation7], %s411_s29  ;;  %s424_s13 = int_to_ptr.vmem [resolvable:$true] %s423_s13 }
  0x3d   : > { %s1391_s30 = sshra.s32 %s422_s20, 4  ;;  %s1398_s17 = scalar_lea.hbm %s1795_s1, 16  ;;  %s1392_s30 = int_to_ptr.hbm [resolvable:$true] %s1391_s30 }
  0x3e   : > { %s1393_s10 = scalar_lea.hbm %s1392_s30, 8  ;;  %p1399_p7 = scmp.lt.s32.totalorder %s1392_s30, %s1795_s1 }
  0x3f   : > { %p1394_p13 = scmp.ne.s32.totalorder %s1392_s30, %s1393_s10  ;;  %p1400_p8 = scmp.lt.s32.totalorder %s1398_s17, %s1393_s10 }
  0x41   : > { %p1396_p2 = pnand %p1394_p13, %p1365_p5  ;;  %p1401_p9 = por %p1400_p8, %p1399_p7 }
  0x43   : > { %p1397_p6 = pneg %p1396_p2 }
  0x45   : > { %p1402_p10 = pnand %p1401_p9, %p1397_p6 }
  0x47   : > { %1405 = shalt.err (!%p1402_p10)
}
  0x48   : > { %1132 = dma.hbm_to_vmem [thread:$0]  (!%p1669_p0), %s422_s20, 128, %s424_s13, %s412_s27  }
  0x49   : > { %432 = sbr.rel (%p1606_p4) target bundleno = 966 (0x3c6), region = 64  ;;  %s434_s26 = sand.u32 (!%p1606_p4), 1, %s1495_s18  }
  0x4a   : > { %s1705_s14 = sshll.u32 (!%p1606_p4), %s434_s26, 3  ;;  %s435_s4 = scalar_lea.sflag (!%p1606_p4), [#allocation4], %s434_s26 }
  0x4b   : > { %s438_s28 = scalar_lea.vmem (!%p1606_p4), [#allocation3], %s1705_s14 }
  0x4e   : > { %1466 = dma.done.wait (%p1656_p12), %s435_s4, 128  }
  0x4f   : > { %1468 = vsyncadd (%p1656_p12), %s435_s4, 4294967168  ;;  %s444_s10 = sand.u32 1, %s1600_s24   ;;  %s448_s25 = scalar_lea.vmem [#allocation6], %s1705_s14 }
  0x50   : > { %s445_s11 = scalar_lea.sflag [#allocation7], %s444_s10 }
  0x51   : > { %1470 = dma.done.wait (%p1656_p12), %s445_s11, 128  }
  0x52   : > { %1472 = vsyncadd (%p1656_p12), %s445_s11, 4294967168 }
  0x53   : > { %1474 = dma.done.wait (%p51_p1), [#allocation7], 512  }
  0x54   : > { %1476 = vsyncadd (%p51_p1), [#allocation7], 4294966784 }
  0x55   : > { %1478 = dma.done.wait (%p51_p1), [#allocation10], 1024  }
  0x56   : > { %1480 = vsyncadd (%p51_p1), [#allocation10], 4294966272 }
  0x57   : > { %1482 = dma.done.wait (%p51_p1), [#allocation13], 2560  }
  0x58   : > { %1484 = vsyncadd (%p51_p1), [#allocation13], 4294964736  ;;  %516 = sbr.rel (%p1049_p3) target bundleno = 95 (0x5f), region = 96 }
  0x5d   : > { %vm517_vm0 = vcmask 0   ;;  %v1514_v0 = vmov 0.0  }
  0x5e   : > { %518 = vst.msk [vmem:[#allocation2] sm:$0x1] %vm517_vm0, %v1514_v0 }
  0x5f PF: > { %v524_v1 = vld [vmem:[#allocation8 + $0x18] sm:$0xff]  ;;  %v523_v2 = vld [vmem:[#allocation8 + $0x10] sm:$0xff]  ;;  %v522_v3 = vld [vmem:[#allocation8 + $0x8] sm:$0xff]  ;;  %vm529_vm1 = vcmask 261120   ;;  %s1076_s6 = sshll.u32 %s1600_s24, 3  ;;  %vm909_vm0 = vcmask 0  }
  0x60   : > { %545 = vmatpush.msra.mxu0 %v524_v1  ;;  %v628_v4 = vmul.f32 0.0009999871, %v524_v1  ;;  %v627_v5 = vmul.f32 0.0009999871, %v523_v2  ;;  %v620_v6 = vld [vmem:[#allocation11 + $0x18] sm:$0xff]  ;;  %v521_v7 = vld [vmem:[#allocation8] sm:$0xff] }
  0x61   : > { %v619_v8 = vld [vmem:[#allocation11 + $0x10] sm:$0xff]  ;;  %v626_v9 = vmul.f32 0.0009999871, %v522_v3  ;;  %v624_v10 = vmul.f32 0.999, %v620_v6  ;;  %v618_v13 = vld [vmem:[#allocation11 + $0x8] sm:$0xff] }
  0x62   : > { %546 = vmatpush.msra.mxu0 %v523_v2  ;;  %v623_v11 = vmul.f32 0.999, %v619_v8  ;;  %v625_v12 = vmul.f32 0.0009999871, %v521_v7  ;;  %v617_v14 = vld [vmem:[#allocation11] sm:$0xff]  ;;  %v557_v20 = vld [vmem:[#allocation9 + $0x18] sm:$0xff] }
  0x63   : > { %v632_v15 = vadd.f32 %v628_v4, %v624_v10  ;;  %v519_v17 = vld [vmem:[%s438_s28] sm:$0xff]  ;;  %v622_v18 = vmul.f32 0.999, %v618_v13  ;;  %v621_v19 = vmul.f32 0.999, %v617_v14  ;;  %577 = vmatpush.msra.mxu1 %v557_v20  ;;  %v520_v23 = vld [vmem:[%s448_s25] sm:$0xff] }
  0x64   : > { %547 = vmatpush.msra.mxu0 %v522_v3  ;;  %v631_v16 = vadd.f32 %v627_v5, %v623_v11  ;;  %v556_v24 = vld [vmem:[#allocation9 + $0x10] sm:$0xff]  ;;  %v555_v25 = vld [vmem:[#allocation9 + $0x8] sm:$0xff]  ;;  %v554_v26 = vld [vmem:[#allocation9] sm:$0xff]  ;;  %v648_v27 = vmul.f32 0.0009999871, %v557_v20  ;;  %p1077_p1 = scmp.ne.s32.totalorder %s1600_s24, 1 }
  0x65   : > { %675 = vmatpush.msra.mxu2 %v632_v15  ;;  %v630_v21 = vadd.f32 %v626_v9, %v622_v18  ;;  %v629_v22 = vadd.f32 %v625_v12, %v621_v19  ;;  %578 = vmatpush.msra.mxu1 %v556_v24  ;;  %v640_v28 = vld [vmem:[#allocation12 + $0x18] sm:$0xff]  ;;  %v647_v29 = vmul.f32 0.0009999871, %v556_v24  ;;  %v639_v31 = vld [vmem:[#allocation12 + $0x10] sm:$0xff]  ;;  %v646_v32 = vmul.f32 0.0009999871, %v555_v25 }
  0x66   : > { %548 = vmatpush.msra.mxu0 %v521_v7  ;;  %v644_v30 = vmul.f32 0.999, %v640_v28  ;;  %v643_v34 = vmul.f32 0.999, %v639_v31  ;;  %v638_v35 = vld [vmem:[#allocation12 + $0x8] sm:$0xff]  ;;  %v637_v39 = vld [vmem:[#allocation12] sm:$0xff] }
  0x67   : > { %1068 = vmatmul.msk.f32.vlgmr.msra.gmra.mxu0 %vm529_vm1, %v519_v17  ;;  %676 = vmatpush.msra.mxu2 %v631_v16  ;;  %v645_v36 = vmul.f32 0.0009999871, %v554_v26  ;;  %v642_v38 = vmul.f32 0.999, %v638_v35  ;;  %v641_v41 = vmul.f32 0.999, %v637_v39 }
  0x68   : > { %579 = vmatpush.msra.mxu1 %v555_v25  ;;  %v652_v33 = vadd.f32 %v648_v27, %v644_v30  ;;  %v651_v37 = vadd.f32 %v647_v29, %v643_v34  ;;  %v1189_v43 = vld [vmem:[%s1797_s3] ss:$0 sm:$0xff]  ;;  %v759_v9 = vld [vmem:[#allocation14 + $0x60] sm:$0xff]  ;;  %v760_v10 = vld [vmem:[#allocation14 + $0x68] sm:$0xff] }
  0x69   : > { %677 = vmatpush.msra.mxu2 %v630_v21  ;;  %v650_v40 = vadd.f32 %v646_v32, %v642_v38  ;;  %v649_v42 = vadd.f32 %v645_v36, %v641_v41  ;;  %v525_v44 = vld [vmem:[%s1797_s3] sm:$0x1]  ;;  %778 = vmatpush.msrb.mxu0 %v759_v9  ;;  %v761_v11 = vld [vmem:[#allocation14 + $0x70] sm:$0xff]  ;;  %v755_v14 = vld [vmem:[#allocation14 + $0x40] sm:$0xff] }
  0x6a   : > { %580 = vmatpush.msra.mxu1 %v554_v26  ;;  %702 = vmatpush.msra.mxu3 %v652_v33  ;;  %v633_v45 = vld [vmem:[%s1801_s7] sm:$0x1]  ;;  %v635_v48 = vmul.f32 0.0009999871, %v525_v44  ;;  %v756_v15 = vld [vmem:[#allocation14 + $0x48] sm:$0xff]  ;;  %v757_v17 = vld [vmem:[#allocation14 + $0x50] sm:$0xff] }
  0x6b   : > { %678 = vmatpush.msra.mxu2 %v629_v22  ;;  %v634_v49 = vmul.f32 0.999, %v633_v45  ;;  %v1190_v56 = vld [vmem:[%s1799_s5] ss:$0 sm:$0xff]  ;;  %779 = vmatpush.msrb.mxu0 %v755_v14  ;;  %v751_v19 = vld [vmem:[#allocation14 + $0x20] sm:$0xff]  ;;  %v752_v20 = vld [vmem:[#allocation14 + $0x28] sm:$0xff] }
  0x6c   : > { %1070 = vmatmul.msk.f32.vlgmr.msra.gmra.mxu2 %vm529_vm1, %v520_v23  ;;  %703 = vmatpush.msra.mxu3 %v651_v37  ;;  %v558_v60 = vld [vmem:[%s1799_s5] sm:$0x1]  ;;  %v753_v22 = vld [vmem:[#allocation14 + $0x30] sm:$0xff]  ;;  %v747_v24 = vld [vmem:[#allocation14] sm:$0xff] }
  0x6d   : > { %v636_v51 = vadd.f32 %v635_v48, %v634_v49  ;;  %v653_v61 = vld [vmem:[%s1803_s9] sm:$0x1]  ;;  %v655_v63 = vmul.f32 0.0009999871, %v558_v60  ;;  %798 = vmatpush.msrb.mxu1 %v760_v10  ;;  %818 = vmatpush.msrb.mxu2 %v761_v11  ;;  %v748_v25 = vld [vmem:[#allocation14 + $0x8] sm:$0xff]  ;;  %v749_v26 = vld [vmem:[#allocation14 + $0x10] sm:$0xff] }
  0x6e   : > { %704 = vmatpush.msra.mxu3 %v650_v40  ;;  %v654_v0 = vmul.f32 0.999, %v653_v61  ;;  %v762_v8 = vld [vmem:[#allocation14 + $0x78] sm:$0xff]  ;;  %780 = vmatpush.msrb.mxu0 %v751_v19 }
  0x6f   : > { %v658_v52 = vperm.slane %v636_v51, 0  ;;  %v758_v13 = vld [vmem:[#allocation14 + $0x58] sm:$0xff]  ;;  %799 = vmatpush.msrb.mxu1 %v756_v15  ;;  %819 = vmatpush.msrb.mxu2 %v757_v17 }
  0x70   : > { %705 = vmatpush.msra.mxu3 %v649_v42  ;;  %v656_v1 = vadd.f32 %v655_v63, %v654_v0  ;;  %v754_v18 = vld [vmem:[#allocation14 + $0x38] sm:$0xff]  ;;  %781 = vmatpush.msrb.mxu0 %v747_v24 }
  0x71   : > { %v750_v23 = vld [vmem:[#allocation14 + $0x18] sm:$0xff]  ;;  %800 = vmatpush.msrb.mxu1 %v752_v20  ;;  %820 = vmatpush.msrb.mxu2 %v753_v22 }
  0x72   : > { %v685_v2 = vperm.slane %v656_v1, 0  ;;  %838 = vmatpush.msrb.mxu3 %v762_v8  ;;  %v850_v8 = vlaneseq }
  0x73   : > { %801 = vmatpush.msrb.mxu1 %v748_v25  ;;  %821 = vmatpush.msrb.mxu2 %v749_v26 }
  0x74   : > { %839 = vmatpush.msrb.mxu3 %v758_v13  ;;  %v851_v9 = vand.u32 127, %v850_v8 }
  0x76   : > { %840 = vmatpush.msrb.mxu3 %v754_v18  ;;  %v854_v10 = vadd.s32 384, %v851_v9 }
  0x78   : > { %841 = vmatpush.msrb.mxu3 %v750_v23  ;;  %vm858_vm14 = vcmp.lt.s32.totalorder %v854_v10, 500 }
  0xe4   : > { %v550_v46 = vpop.f32.mrf.mxu0 }
  0xe5   : > { %v551_v47 = vadd.f32 %v1189_v43, %v550_v46 }
  0xe7   : > { %v553_v50 = vmax.f32 %v551_v47, 0.0 }
  0xe9   : > { %1069 = vmatmul.msk.f32.vlgmr.msra.gmra.mxu1 %vm529_vm1, %v553_v50 }
  0xef   : > { %v680_v53 = vpop.f32.mrf.mxu2 }
  0xf0   : > { %v681_v54 = vadd.f32 %v680_v53, %v658_v52 }
  0xf2   : > { %v683_v55 = vmax.f32 %v681_v54, 0.0 }
  0xf4   : > { %1071 = vmatmul.msk.f32.vlgmr.msra.gmra.mxu3 %vm529_vm1, %v683_v55 }
 0x166   : > { %v582_v57 = vpop.f32.mrf.mxu1 }
 0x167   : > { %v1752_v58 = vadd.f32 %v1190_v56, %v582_v57 }
 0x169   : > { %v585_v59 = vmul.f32 %v1752_v58, %v1752_v58 }
 0x16b   : > { %v586_v62 = vsel %vm529_vm1, %v585_v59, 0.0 }
 0x16c   : > { %587 = vadd.xlane.f32.xlu0 %v586_v62 }
 0x177   : > { %v707_v3 = vpop.f32.mrf.mxu3 }
 0x178   : > { %v1763_v4 = vadd.f32 %v707_v3, %v685_v2 }
 0x17a   : > { %v710_v5 = vmul.f32 %v1763_v4, %v1763_v4 }
 0x17c   : > { %v711_v6 = vsel %vm529_vm1, %v710_v5, 0.0 }
 0x17d   : > { %712 = vadd.xlane.f32.xlu0 %v711_v6 }
 0x1df   : > { %v588_v7 = vpop.xlane.xlu0 %587 }
 0x1e0   : > { %1191 = vrsqrt.f32 %v588_v7  ;;  %vm596_vm2 = vcmp.eq.f32.partialorder %v588_v7, inf  ;;  %v599_v32 = vand.u32 2147483648, %v588_v7  ;;  %vm598_vm3 = vcmp.eq.f32.partialorder %v588_v7, 0.0 }
 0x1e6   : > { %v1192_v12 = vpop.eup %1191 }
 0x1e7   : > { %v590_v16 = vmul.f32 %v1192_v12, %v588_v7 }
 0x1e9   : > { %v591_v21 = vmul.f32 %v1192_v12, %v590_v16 }
 0x1eb   : > { %v592_v27 = vmul.f32 0.5, %v591_v21 }
 0x1ed   : > { %v593_v28 = vsub.f32 1.5, %v592_v27 }
 0x1ef   : > { %v594_v29 = vmul.f32 %v1192_v12, %v593_v28 }
 0x1f0   : > { %v713_v31 = vpop.xlane.xlu0 %712 }
 0x1f1   : > { %v595_v30 = vmul.f32 %v594_v29, %v588_v7  ;;  %1193 = vrsqrt.f32 %v713_v31  ;;  %vm721_vm4 = vcmp.eq.f32.partialorder %v713_v31, inf  ;;  %v724_v46 = vand.u32 2147483648, %v713_v31 }
 0x1f2   : > { %vm723_vm6 = vcmp.eq.f32.partialorder %v713_v31, 0.0 }
 0x1f3   : > { %v597_v33 = vsel %vm596_vm2, %v588_v7, %v595_v30 }
 0x1f4   : > { %v600_v34 = vsel %vm598_vm3, %v599_v32, %v597_v33 }
 0x1f5   : > { %v601_v35 = vmax.f32 %v600_v34, 1e-12 }
 0x1f7   : > { %1195 = vrcp.f32 %v601_v35  ;;  %v1194_v36 = vpop.eup %1193  ;;  %v613_v45 = vand.u32 2147483648, %v601_v35  ;;  %v611_v48 = vand.u32 2147483647, %v601_v35  ;;  %vm607_vm7 = vweird.f32 %v601_v35 }
 0x1f8   : > { %v715_v37 = vmul.f32 %v1194_v36, %v713_v31 }
 0x1f9   : > { %v614_v52 = vor.u32 1.1754944e-38, %v613_v45  ;;  %vm612_vm9 = vcmp.eq.f32.partialorder %v611_v48, 8.507059e+37 }
 0x1fa   : > { %v716_v38 = vmul.f32 %v1194_v36, %v715_v37 }
 0x1fc   : > { %v717_v40 = vmul.f32 0.5, %v716_v38 }
 0x1fd   : > { %v1196_v39 = vpop.eup %1195 }
 0x1fe   : > { %v603_v41 = vmul.f32 %v1196_v39, %v601_v35  ;;  %v718_v42 = vsub.f32 1.5, %v717_v40  ;;  %vm608_vm5 = vweird.f32 %v1196_v39 }
 0x1ff   : > { %vm609_vm8 = vmor %vm607_vm7, %vm608_vm5 }
 0x200   : > { %v604_v43 = vsub.f32 1.0, %v603_v41  ;;  %v719_v44 = vmul.f32 %v1194_v36, %v718_v42 }
 0x202   : > { %v605_v47 = vmul.f32 %v1196_v39, %v604_v43  ;;  %v720_v49 = vmul.f32 %v719_v44, %v713_v31 }
 0x204   : > { %v606_v50 = vadd.f32 %v1196_v39, %v605_v47  ;;  %v722_v51 = vsel %vm721_vm4, %v713_v31, %v720_v49  ;;  %v897_v47 = vstv %s1076_s6 }
 0x205   : > { %v725_v53 = vsel %vm723_vm6, %v724_v46, %v722_v51  ;;  %v895_v46 = vshrl.u32 %v850_v8, 7 }
 0x206   : > { %v610_v54 = vsel %vm609_vm8, %v1196_v39, %v606_v50  ;;  %v726_v55 = vmax.f32 %v725_v53, 1e-12 }
 0x207   : > { %v615_v56 = vsel %vm612_vm9, %v614_v52, %v610_v54  ;;  %v898_v49 = vadd.s32 %v897_v47, %v895_v46 }
 0x208   : > { %v616_v57 = vmul.f32 %v615_v56, %v1752_v58  ;;  %1197 = vrcp.f32 %v726_v55  ;;  %v738_v61 = vand.u32 2147483648, %v726_v55  ;;  %vm732_vm10 = vweird.f32 %v726_v55 }
 0x209   : > { %v736_v63 = vand.u32 2147483647, %v726_v55  ;;  %vm899_vm15 = vcmp.lt.s32.totalorder %v898_v49, 13 }
 0x20a   : > { %1072 = vmatmul.msk.f32.vlgmr.msrb.gmra.mxu0 %vm529_vm1, %v616_v57  ;;  %1073 = vmatmul.msk.f32.vlgmr.msrb.gmra.mxu1 %vm529_vm1, %v616_v57  ;;  %v739_v1 = vor.u32 1.1754944e-38, %v738_v61 }
 0x20b   : > { %1074 = vmatmul.msk.f32.vlgmr.msrb.gmra.mxu2 %vm529_vm1, %v616_v57  ;;  %1075 = vmatmul.msk.f32.vlgmr.msrb.gmra.mxu3 %vm529_vm1, %v616_v57  ;;  %vm737_vm13 = vcmp.eq.f32.partialorder %v736_v63, 8.507059e+37 }
 0x20e   : > { %v1198_v59 = vpop.eup %1197 }
 0x20f   : > { %v728_v60 = vmul.f32 %v1198_v59, %v726_v55  ;;  %vm733_vm11 = vweird.f32 %v1198_v59 }
 0x210   : > { %vm734_vm12 = vmor %vm732_vm10, %vm733_vm11 }
 0x211   : > { %v729_v62 = vsub.f32 1.0, %v728_v60  ;;  %v901_v60 = vld [vmem:[#allocation2] sm:$0x1] }
 0x213   : > { %v730_v0 = vmul.f32 %v1198_v59, %v729_v62 }
 0x215   : > { %v731_v58 = vadd.f32 %v1198_v59, %v730_v0 }
 0x217   : > { %v735_v2 = vsel %vm734_vm12, %v1198_v59, %v731_v58 }
 0x218   : > { %v740_v3 = vsel %vm737_vm13, %v739_v1, %v735_v2 }
 0x219   : > { %v741_v5 = vmul.f32 %v740_v3, %v1763_v4 }
 0x21b   : > { %v742_v6 = vmul.f32 %v741_v5, %v616_v57 }
 0x21d   : > { %v743_v7 = vsel %vm529_vm1, %v742_v6, 0.0 }
 0x21e   : > { %744 = vadd.xlane.f32.xlu1 %v743_v7 }
 0x287   : > { %v783_v11 = vpop.f32.mrf.mxu0  ;;  %v803_v12 = vpop.f32.mrf.mxu1 }
 0x288   : > { %v846_v13 = vmul.f32 14.285714, %v783_v11  ;;  %v847_v14 = vmul.f32 14.285714, %v803_v12 }
 0x28a   : > { %v863_v20 = vmax.f32 %v846_v13, %v847_v14 }
 0x28e   : > { %v823_v15 = vpop.f32.mrf.mxu2  ;;  %v843_v16 = vpop.f32.mrf.mxu3 }
 0x28f   : > { %v848_v17 = vmul.f32 14.285714, %v823_v15  ;;  %v849_v18 = vmul.f32 14.285714, %v843_v16 }
 0x291   : > { %v862_v19 = vsel %vm858_vm14, %v849_v18, -1e+30  ;;  %v745_v22 = vpop.xlane.xlu1 %744 }
 0x292   : > { %v864_v21 = vmax.f32 %v848_v17, %v862_v19  ;;  %v746_v23 = vmul.f32 14.285714, %v745_v22 }
 0x294   : > { %v865_v4 = vmax.f32 %v863_v20, %v864_v21 }
 0x296   : > { %866 = vmax.xlane.f32.xlu1 %v865_v4 }
 0x309   : > { %v867_v24 = vpop.xlane.xlu1 %866 }
 0x30a   : > { %v868_v25 = vmax.f32 %v746_v23, %v867_v24 }
 0x30c   : > { %v872_v26 = vsub.f32 %v846_v13, %v868_v25  ;;  %v873_v27 = vsub.f32 %v847_v14, %v868_v25  ;;  %v874_v28 = vsub.f32 %v848_v17, %v868_v25  ;;  %v875_v29 = vsub.f32 %v862_v19, %v868_v25 }
 0x30d   : > { %v869_v41 = vsub.f32 %v746_v23, %v868_v25 }
 0x30e   : > { %v876_v30 = vmul.f32 1.442695, %v872_v26  ;;  %v878_v31 = vmul.f32 1.442695, %v873_v27  ;;  %v880_v32 = vmul.f32 1.442695, %v874_v28 }
 0x30f   : > { %v882_v33 = vmul.f32 1.442695, %v875_v29  ;;  %v870_v42 = vmul.f32 1.442695, %v869_v41 }
 0x310   : > { %1199 = vpow2.f32 %v876_v30 }
 0x311   : > { %1201 = vpow2.f32 %v878_v31 }
 0x312   : > { %1203 = vpow2.f32 %v880_v32 }
 0x313   : > { %1205 = vpow2.f32 %v882_v33 }
 0x314   : > { %1207 = vpow2.f32 %v870_v42 }
 0x316   : > { %v1200_v34 = vpop.eup %1199 }
 0x317   : > { %v1202_v35 = vpop.eup %1201 }
 0x318   : > { %v884_v36 = vadd.f32 %v1202_v35, %v1200_v34  ;;  %v1204_v37 = vpop.eup %1203 }
 0x319   : > { %v1206_v39 = vpop.eup %1205 }
 0x31a   : > { %v885_v38 = vadd.f32 %v1204_v37, %v884_v36  ;;  %v1208_v43 = vpop.eup %1207 }
 0x31c   : > { %v886_v40 = vadd.f32 %v1206_v39, %v885_v38 }
 0x31e   : > { %887 = vadd.xlane.f32.xlu2 %v886_v40 }
 0x391   : > { %v888_v44 = vpop.xlane.xlu2 %887 }
 0x392   : > { %v889_v45 = vadd.f32 %v1208_v43, %v888_v44 }
 0x394   : > { %1209 = vlog2.f32 %v889_v45 }
 0x39a   : > { %v1210_v48 = vpop.eup %1209 }
 0x39b   : > { %v891_v50 = vmul.f32 0.6931472, %v1210_v48 }
 0x39d   : > { %v892_v51 = vadd.f32 %v891_v50, %v868_v25 }
 0x39f   : > { %v893_v52 = vsub.f32 %v892_v51, %v746_v23 }
 0x3a1   : > { %v900_v53 = vsel %vm899_vm15, %v893_v52, 0.0 }
 0x3a2   : > { %v902_v54 = vrot.slane %v900_v53, 4 }
 0x3a4   : > { %v903_v55 = vadd.f32 %v902_v54, %v900_v53 }
 0x3a6   : > { %v904_v56 = vrot.slane %v903_v55, 2 }
 0x3a8   : > { %v905_v57 = vadd.f32 %v904_v56, %v903_v55 }
 0x3aa   : > { %v906_v59 = vrot.slane %v905_v57, 1 }
 0x3ac   : > { %v907_v61 = vadd.f32 %v906_v59, %v905_v57  ;;  %914 = sbr.rel (%p1077_p1) target bundleno = 955 (0x3bb), region = 100 }
 0x3ae   : > { %v908_v62 = vadd.f32 %v907_v61, %v901_v60 }
 0x3b0   : > { %910 = vst.msk [vmem:[#allocation2] sm:$0x1] %vm909_vm0, %v908_v62 }
 0x3b7   : > { %v915_v63 = vld [vmem:[#allocation2] sm:$0x1] }
 0x3b8   : > { %v916_v0 = vmul.f32 0.07692308, %v915_v63 }
 0x3ba   : > { %917 = vst.msk [vmem:[#allocation15] sm:$0x1] %vm909_vm0, %v916_v0 }
 0x3bb PF: > { %p1144_p3 = scmp.eq.s32.totalorder %s1600_s24, 1  ;;  %s1515_s26 = smov [#allocation15]  }
 0x3bc   : > { %s924_s14 = sshll.u32 %s1515_s26, 4  ;;  %s1821_s10 = sld [smem:[#allocation27_spill]]  ;;  %s925_s14 = int_to_ptr.vmem [resolvable:$true] %s924_s14 }
 0x3c2   : > { %s926_s11 = sshll.u32 %s1821_s10, 4  ;;  %s927_s11 = int_to_ptr.hbm [resolvable:$true] %s926_s11 }
 0x3c3   : > { %1107 = dma.vmem_to_hbm [thread:$0]  (%p1144_p3), %s925_s14, 16, %s927_s11, [#allocation5]  }
 0x3c4   : > { %1486 = dma.done.wait (%p1144_p3), [#allocation5], 16  }
 0x3c5   : > { %1488 = vsyncadd (%p1144_p3), [#allocation5], 4294967280 }
 0x3c6 PF: > { %p27_p4 = scmp.ge.s32.totalorder %s1641_s21, 4   ;;  %s1822_s17 = smov %s1495_s18 }
 0x3c7   : > { %s1823_s18 = smov %s1499_s19  ;;  %s1824_s19 = smov %s1652_s2 }
 0x3c8   : > { %s1825_s20 = smov %s1641_s21  ;;  %29 = sbr.rel (!%p27_p4) target bundleno = 15 (0xf), region = 142 }
 0x3cd   :  { %940 = vsyncpa [#allocation4], 1 }
 0x3ce   :  { %942 = vsyncpa [#allocation4 + $0x1], 1 }
 0x3cf   :  { %943 = vsyncpa [#allocation7], 1 }
 0x3d0   :  { %945 = vsyncpa [#allocation7 + $0x1], 1 }
 0x3d1   :  { %946 = vsyncpa [#allocation10], 1 }
 0x3d2   :  { %947 = vsyncpa [#allocation13], 1 }
 0x3d3   :  { %948 = vsyncpa [#allocation5], 1 }
 0x3d4   :  { %950 = vsyncpa [#allocation5 + $0x1], 1 }

</bundles_post_ra>
